<compile_context>
chip_gen: v6e
topology: v6e:2x2x1
jax: 0.10.0
libtpu: 0.0.40
codegen_flags: <defaults>
</compile_context>

<pallas_src>
import jax
import jax.numpy as jnp
from jax.experimental import pallas as pl
from jax.experimental.pallas import tpu as pltpu


# ---------------------------------------------------------------------------
# Problem sizes (consistent with the module's constructor logic):
#   hidden_size (MPN output)   H  = 32
#   cell_line_size             C  = 16
#   dsn_architecture "64-32"   -> dsn_layers = [H + C, 64, 32]
#   embedding_agg 'concat'     -> spn_input  = 2 * 32 = 64
#   spn_architecture "32-16"   -> spn_layers = [64, 32, 16] + final Linear(16, 1)
# ---------------------------------------------------------------------------
B = 8          # batch
H = 32         # drug encoding size (args.hidden_size)
C = 16         # cell line feature size (args.cell_line_size)
DSN_IN = H + C                 # 48
DSN_H1 = 64
DSN_OUT = 32
SPN_IN = 2 * DSN_OUT           # 64 (concat aggregation)
SPN_H1 = 32
SPN_H2 = 16

LANE = 128                     # every packed weight is 128 lanes wide

# ----- packed bf16 weight slab layout (row offsets; all 16-row aligned) ------
ROWS_WD = H                    # dw1 drug rows                       [32, 128]
ROWS_WC = C                    # dw1 cell rows                       [16, 128]
ROWS_W2 = 128                  # folded dw2@sw1_top / dw2@sw1_bot    [128,128]
ROWS_W3 = 128                  # sw2 (K padded to 128)               [128,128]
ROWS_W4 = 16                   # sw3^T in row 0                      [16, 128]
ROWS_B = 16                    # all biases, one per sublane row     [16, 128]
OFF_WD = 0
OFF_WC = OFF_WD + ROWS_WD      # 32
OFF_W2A = OFF_WC + ROWS_WC     # 48
OFF_W2B = OFF_W2A + ROWS_W2    # 176
OFF_W3 = OFF_W2B + ROWS_W2     # 304
OFF_W4 = OFF_W3 + ROWS_W3      # 432
OFF_B = OFF_W4 + ROWS_W4       # 448
SLAB_ROWS = OFF_B + ROWS_B     # 464 rows * 128 lanes * 2 B ~= 116 KiB


def matchmaker_kernel(d0_ref, d1_ref, cell_ref, slab_ref, o_ref):
    """Fused DSN+SPN: 6 MXU dots, bf16 operands, f32 accumulate, no copies."""
    f32 = jnp.float32
    bf16 = jnp.bfloat16

    d0 = d0_ref[...].astype(bf16)                           # [tb, 32]
    d1 = d1_ref[...].astype(bf16)                           # [tb, 32]
    cl = cell_ref[...].astype(bf16)                         # [tb, 16]

    wd = slab_ref[OFF_WD:OFF_WD + ROWS_WD, :]               # [32, 128] bf16
    wc = slab_ref[OFF_WC:OFF_WC + ROWS_WC, :]               # [16, 128]
    w2a = slab_ref[OFF_W2A:OFF_W2A + ROWS_W2, :]            # [128,128]
    w2b = slab_ref[OFF_W2B:OFF_W2B + ROWS_W2, :]            # [128,128]
    w3 = slab_ref[OFF_W3:OFF_W3 + ROWS_W3, :]               # [128,128]
    w4 = slab_ref[OFF_W4:OFF_W4 + ROWS_W4, :]               # [16, 128]
    biases = slab_ref[OFF_B:OFF_B + ROWS_B, :].astype(f32)  # [16, 128] f32
    b1 = biases[0:1, :]          # db1
    b2 = biases[1:2, :]          # db2@sw1_top + db2@sw1_bot + sb1 (fused)
    b3 = biases[2:3, :]          # sb2
    b4 = biases[3:4, 0:1]        # sb3 (scalar)

    # --- DSN layer 1: cat(drug, cell) @ W1 == drug @ Wd + cell @ Wc.
    #     The cell contribution is computed once and shared by both drugs.
    cell_part = jnp.dot(cl, wc, preferred_element_type=f32)           # [tb, 128]
    ha = jnp.maximum(jnp.dot(d0, wd, preferred_element_type=f32)
                     + cell_part + b1, 0.0).astype(bf16)              # [tb, 128]
    hb = jnp.maximum(jnp.dot(d1, wd, preferred_element_type=f32)
                     + cell_part + b1, 0.0).astype(bf16)              # [tb, 128]

    # --- DSN layer 2 folded into SPN layer 1 (no nonlinearity between them):
    #     relu(e1@sw1_top + e2@sw1_bot + sb1) == relu(ha@W2A + hb@W2B + b2).
    h2 = jnp.maximum(jnp.dot(ha, w2a, preferred_element_type=f32)
                     + jnp.dot(hb, w2b, preferred_element_type=f32)
                     + b2, 0.0).astype(bf16)                          # [tb, 128]

    # --- SPN layer 2
    h3 = jnp.maximum(jnp.dot(h2, w3, preferred_element_type=f32)
                     + b3, 0.0).astype(bf16)                          # [tb, 128]

    # --- SPN layer 3 (Linear(16, 1)) as a transposed contraction so the
    #     result lands as a lane-dense [1, tb] row (4 B of writeback per
    #     sample instead of 512 B).  Rows 1..15 of w4 are zero padding.
    out16 = jax.lax.dot_general(w4, h3, (((1,), (1,)), ((), ())),
                                preferred_element_type=f32)           # [16, tb]
    o_ref[...] = out16[0:1, :] + b4                                   # [1, tb]


def _batch_tile(b):
    # Large batches: biggest 128-aligned tile that still yields >= 2 grid steps
    # (so both v7x TensorCores get work via dimension_semantics="parallel").
    for tb in (2048, 1024, 512, 256, 128):
        if b % tb == 0 and b // tb >= 2:
            return tb
    # Small / awkward batches: one full-batch tile (grid of 1).
    # TODO(synk): ragged last tile for batches that are not a multiple of 128.
    return b


def matchmaker_forward(drug_enc0, drug_enc1, cell, slab):
    b = drug_enc0.shape[0]
    tb = _batch_tile(b)

    out = pl.pallas_call(
        matchmaker_kernel,
        out_shape=jax.ShapeDtypeStruct((1, b), jnp.float32),
        grid_spec=pltpu.PrefetchScalarGridSpec(
            num_scalar_prefetch=0,
            grid=(b // tb,),
            in_specs=[
                pl.BlockSpec((tb, H), lambda i: (i, 0)),              # drug_enc0
                pl.BlockSpec((tb, H), lambda i: (i, 0)),              # drug_enc1
                pl.BlockSpec((tb, C), lambda i: (i, 0)),              # cell
                pl.BlockSpec((SLAB_ROWS, LANE), lambda i: (0, 0)),    # weights
            ],
            out_specs=pl.BlockSpec((1, tb), lambda i: (0, i)),
        ),
        compiler_params=pltpu.CompilerParams(
            dimension_semantics=("parallel",),    # 2 TensorCores on v7x
            vmem_limit_bytes=48 * 1024 * 1024,    # headroom below v7x's 64 MiB
        ),
    )(drug_enc0, drug_enc1, cell, slab)
    return out[0]                                 # == SPN(...).flatten()


# ---------------------------------------------------------------------------
# Parameter construction / packing
# ---------------------------------------------------------------------------
def init_params(key):
    """Deterministic synthetic weights (stored as [in, out]); biases as [1, out]."""
    ks = jax.random.split(key, 5)

    def lin(k, fan_in, fan_out):
        scale = 1.0 / jnp.sqrt(jnp.float32(fan_in))
        w = jax.random.uniform(k, (fan_in, fan_out), jnp.float32, -scale, scale)
        b = jnp.full((1, fan_out), 0.01, jnp.float32)
        return w, b

    dw1, db1 = lin(ks[0], DSN_IN, DSN_H1)
    dw2, db2 = lin(ks[1], DSN_H1, DSN_OUT)
    sw1, sb1 = lin(ks[2], SPN_IN, SPN_H1)
    sw2, sb2 = lin(ks[3], SPN_H1, SPN_H2)
    sw3, sb3 = lin(ks[4], SPN_H2, 1)
    return {
        "dw1": dw1, "db1": db1, "dw2": dw2, "db2": db2,
        "sw1": sw1, "sb1": sb1, "sw2": sw2, "sb2": sb2,
        "sw3": sw3, "sb3": sb3,
    }


def pack_params(params):
    """Fold DSN-L2 into SPN-L1 (f32) and pack everything into one bf16 slab."""
    f32 = jnp.float32

    def pad(a, rows):
        a = jnp.asarray(a, f32)
        return jnp.pad(a, ((0, rows - a.shape[0]), (0, LANE - a.shape[1])))

    dw1, db1 = params["dw1"], params["db1"]
    dw2, db2 = params["dw2"], params["db2"]
    sw1, sb1 = params["sw1"], params["sb1"]
    sw2, sb2 = params["sw2"], params["sb2"]
    sw3, sb3 = params["sw3"], params["sb3"]

    # Fold: comb @ sw1 + sb1 == ha@(dw2@sw1_top) + hb@(dw2@sw1_bot)
    #                           + db2@sw1_top + db2@sw1_bot + sb1
    sw1_top, sw1_bot = sw1[:DSN_OUT, :], sw1[DSN_OUT:, :]
    w2a = dw2 @ sw1_top                       # [64, 32]
    w2b = dw2 @ sw1_bot                       # [64, 32]
    b2f = db2 @ (sw1_top + sw1_bot) + sb1     # [1, 32]

    # All biases in one 16-row block (bias i lives in sublane row i).
    bias_blk = jnp.zeros((ROWS_B, LANE), f32)
    bias_blk = bias_blk.at[0, :DSN_H1].set(db1[0])
    bias_blk = bias_blk.at[1, :SPN_H1].set(b2f[0])
    bias_blk = bias_blk.at[2, :SPN_H2].set(sb2[0])
    bias_blk = bias_blk.at[3, 0].set(sb3[0, 0])

    blocks = [
        pad(dw1[:H, :], ROWS_WD),             # Wd: drug rows of dw1
        pad(dw1[H:, :], ROWS_WC),             # Wc: cell rows of dw1
        pad(w2a, ROWS_W2),                    # folded layer, e1 half
        pad(w2b, ROWS_W2),                    # folded layer, e2 half
        pad(sw2, ROWS_W3),                    # SPN layer 2
        pad(sw3.T, ROWS_W4),                  # SPN layer 3, transposed (row 0)
        bias_blk,
    ]
    slab = jnp.concatenate(blocks, axis=0)
    assert slab.shape == (SLAB_ROWS, LANE), slab.shape
    return slab.astype(jnp.bfloat16)


# ---------------------------------------------------------------------------
# Pure-JAX f32 reference (matches the PyTorch forward at inference)
# ---------------------------------------------------------------------------
def reference_forward(drug_enc0, drug_enc1, cell, params):
    x1 = jnp.concatenate([drug_enc0, cell], axis=1)
    x2 = jnp.concatenate([drug_enc1, cell], axis=1)

    def dsn(x):
        h = jnp.maximum(x @ params["dw1"] + params["db1"], 0.0)
        return h @ params["dw2"] + params["db2"]

    e1, e2 = dsn(x1), dsn(x2)
    comb = jnp.concatenate([e1, e2], axis=1)
    h = jnp.maximum(comb @ params["sw1"] + params["sb1"], 0.0)
    h = jnp.maximum(h @ params["sw2"] + params["sb2"], 0.0)
    return (h @ params["sw3"] + params["sb3"]).reshape(-1)


if __name__ == "__main__":
    key = jax.random.PRNGKey(0)
    k_p, k_d0, k_d1, k_c = jax.random.split(key, 4)

    params = init_params(k_p)
    slab = pack_params(params)

    drug_enc0 = jax.random.normal(k_d0, (B, H), jnp.float32)   # drug_encodings[0]
    drug_enc1 = jax.random.normal(k_d1, (B, H), jnp.float32)   # drug_encodings[1]
    cell = jax.random.normal(k_c, (B, C), jnp.float32)         # cell_batch

    out = matchmaker_forward(drug_enc0, drug_enc1, cell, slab)
    out = jax.block_until_ready(out)

    ref = reference_forward(drug_enc0, drug_enc1, cell, params)
    assert out.shape == (B,), out.shape
    # bf16 weights/activations on the MXU -> loosened tolerance vs f32 reference.
    assert jnp.allclose(out, ref, atol=3e-2, rtol=3e-2), (out, ref)

    print("KERNEL_OK")
</pallas_src>

<mosaic_0001>
module attributes {stable_mosaic.version = 11 : i64} {
  func.func @matchmaker_kernel(%arg0: i32, %arg1: memref<8x32xf32, #tpu.memory_space<vmem>>, %arg2: memref<8x32xf32, #tpu.memory_space<vmem>>, %arg3: memref<8x16xf32, #tpu.memory_space<vmem>>, %arg4: memref<464x128xbf16, #tpu.memory_space<vmem>>, %arg5: memref<1x8xf32, #tpu.memory_space<vmem>>) attributes {dimension_semantics = [#tpu.dimension_semantics<parallel>], iteration_bounds = array<i64: 1>, scalar_prefetch = 0 : i64, scratch_operands = 0 : i64, tpu.core_type = #tpu.core_type<tc>, window_params = [{transform_indices = @transform_0, window_bounds = array<i64: 8, 32>}, {transform_indices = @transform_1, window_bounds = array<i64: 8, 32>}, {transform_indices = @transform_2, window_bounds = array<i64: 8, 16>}, {pipeline_mode = #tpu.pipeline_mode<synchronous>, transform_indices = @transform_3, window_bounds = array<i64: 464, 128>}, {transform_indices = @transform_4, window_bounds = array<i64: 1, 8>}]} {
    %c0 = arith.constant 0 : index
    %c0_0 = arith.constant 0 : index
    %0 = vector.load %arg1[%c0, %c0_0] : memref<8x32xf32, #tpu.memory_space<vmem>>, vector<8x32xf32>
    %1 = arith.truncf %0 : vector<8x32xf32> to vector<8x32xbf16>
    %c0_1 = arith.constant 0 : index
    %c0_2 = arith.constant 0 : index
    %2 = vector.load %arg2[%c0_1, %c0_2] : memref<8x32xf32, #tpu.memory_space<vmem>>, vector<8x32xf32>
    %3 = arith.truncf %2 : vector<8x32xf32> to vector<8x32xbf16>
    %c0_3 = arith.constant 0 : index
    %c0_4 = arith.constant 0 : index
    %4 = vector.load %arg3[%c0_3, %c0_4] : memref<8x16xf32, #tpu.memory_space<vmem>>, vector<8x16xf32>
    %5 = arith.truncf %4 : vector<8x16xf32> to vector<8x16xbf16>
    %c0_5 = arith.constant 0 : index
    %c0_6 = arith.constant 0 : index
    %6 = vector.load %arg4[%c0_5, %c0_6] : memref<464x128xbf16, #tpu.memory_space<vmem>>, vector<32x128xbf16>
    %c32 = arith.constant 32 : index
    %c0_7 = arith.constant 0 : index
    %7 = vector.load %arg4[%c32, %c0_7] : memref<464x128xbf16, #tpu.memory_space<vmem>>, vector<16x128xbf16>
    %c48 = arith.constant 48 : index
    %c0_8 = arith.constant 0 : index
    %8 = vector.load %arg4[%c48, %c0_8] : memref<464x128xbf16, #tpu.memory_space<vmem>>, vector<128x128xbf16>
    %c176 = arith.constant 176 : index
    %c0_9 = arith.constant 0 : index
    %9 = vector.load %arg4[%c176, %c0_9] : memref<464x128xbf16, #tpu.memory_space<vmem>>, vector<128x128xbf16>
    %c304 = arith.constant 304 : index
    %c0_10 = arith.constant 0 : index
    %10 = vector.load %arg4[%c304, %c0_10] : memref<464x128xbf16, #tpu.memory_space<vmem>>, vector<128x128xbf16>
    %c432 = arith.constant 432 : index
    %c0_11 = arith.constant 0 : index
    %11 = vector.load %arg4[%c432, %c0_11] : memref<464x128xbf16, #tpu.memory_space<vmem>>, vector<16x128xbf16>
    %c448 = arith.constant 448 : index
    %c0_12 = arith.constant 0 : index
    %12 = vector.load %arg4[%c448, %c0_12] : memref<464x128xbf16, #tpu.memory_space<vmem>>, vector<16x128xbf16>
    %13 = arith.extf %12 : vector<16x128xbf16> to vector<16x128xf32>
    %14 = vector.extract_strided_slice %13 {offsets = [0, 0], sizes = [1, 128], strides = [1, 1]} : vector<16x128xf32> to vector<1x128xf32>
    %15 = vector.extract_strided_slice %13 {offsets = [1, 0], sizes = [1, 128], strides = [1, 1]} : vector<16x128xf32> to vector<1x128xf32>
    %16 = vector.extract_strided_slice %13 {offsets = [2, 0], sizes = [1, 128], strides = [1, 1]} : vector<16x128xf32> to vector<1x128xf32>
    %17 = vector.extract_strided_slice %13 {offsets = [3, 0], sizes = [1, 1], strides = [1, 1]} : vector<16x128xf32> to vector<1x1xf32>
    %cst = arith.constant dense<0.000000e+00> : vector<8x128xf32>
    %18 = tpu.matmul %5, %7, %cst {dimension_numbers = #tpu.dot_dimension_numbers<[1], [0], [0], [1], [0, 0, 1, 1], [], []>} : vector<8x16xbf16>, vector<16x128xbf16>, vector<8x128xf32> -> vector<8x128xf32>
    %cst_13 = arith.constant dense<0.000000e+00> : vector<8x128xf32>
    %19 = tpu.matmul %1, %6, %cst_13 {dimension_numbers = #tpu.dot_dimension_numbers<[1], [0], [0], [1], [0, 0, 1, 1], [], []>} : vector<8x32xbf16>, vector<32x128xbf16>, vector<8x128xf32> -> vector<8x128xf32>
    %20 = arith.addf %19, %18 : vector<8x128xf32>
    %21 = vector.broadcast %14 : vector<1x128xf32> to vector<8x128xf32>
    %22 = arith.addf %20, %21 : vector<8x128xf32>
    %cst_14 = arith.constant 0.000000e+00 : f32
    %23 = vector.broadcast %cst_14 : f32 to vector<8x128xf32>
    %24 = arith.maximumf %22, %23 : vector<8x128xf32>
    %25 = arith.truncf %24 : vector<8x128xf32> to vector<8x128xbf16>
    %cst_15 = arith.constant dense<0.000000e+00> : vector<8x128xf32>
    %26 = tpu.matmul %3, %6, %cst_15 {dimension_numbers = #tpu.dot_dimension_numbers<[1], [0], [0], [1], [0, 0, 1, 1], [], []>} : vector<8x32xbf16>, vector<32x128xbf16>, vector<8x128xf32> -> vector<8x128xf32>
    %27 = arith.addf %26, %18 : vector<8x128xf32>
    %28 = vector.broadcast %14 : vector<1x128xf32> to vector<8x128xf32>
    %29 = arith.addf %27, %28 : vector<8x128xf32>
    %cst_16 = arith.constant 0.000000e+00 : f32
    %30 = vector.broadcast %cst_16 : f32 to vector<8x128xf32>
    %31 = arith.maximumf %29, %30 : vector<8x128xf32>
    %32 = arith.truncf %31 : vector<8x128xf32> to vector<8x128xbf16>
    %cst_17 = arith.constant dense<0.000000e+00> : vector<8x128xf32>
    %33 = tpu.matmul %25, %8, %cst_17 {dimension_numbers = #tpu.dot_dimension_numbers<[1], [0], [0], [1], [0, 0, 1, 1], [], []>} : vector<8x128xbf16>, vector<128x128xbf16>, vector<8x128xf32> -> vector<8x128xf32>
    %cst_18 = arith.constant dense<0.000000e+00> : vector<8x128xf32>
    %34 = tpu.matmul %32, %9, %cst_18 {dimension_numbers = #tpu.dot_dimension_numbers<[1], [0], [0], [1], [0, 0, 1, 1], [], []>} : vector<8x128xbf16>, vector<128x128xbf16>, vector<8x128xf32> -> vector<8x128xf32>
    %35 = arith.addf %33, %34 : vector<8x128xf32>
    %36 = vector.broadcast %15 : vector<1x128xf32> to vector<8x128xf32>
    %37 = arith.addf %35, %36 : vector<8x128xf32>
    %cst_19 = arith.constant 0.000000e+00 : f32
    %38 = vector.broadcast %cst_19 : f32 to vector<8x128xf32>
    %39 = arith.maximumf %37, %38 : vector<8x128xf32>
    %40 = arith.truncf %39 : vector<8x128xf32> to vector<8x128xbf16>
    %cst_20 = arith.constant dense<0.000000e+00> : vector<8x128xf32>
    %41 = tpu.matmul %40, %10, %cst_20 {dimension_numbers = #tpu.dot_dimension_numbers<[1], [0], [0], [1], [0, 0, 1, 1], [], []>} : vector<8x128xbf16>, vector<128x128xbf16>, vector<8x128xf32> -> vector<8x128xf32>
    %42 = vector.broadcast %16 : vector<1x128xf32> to vector<8x128xf32>
    %43 = arith.addf %41, %42 : vector<8x128xf32>
    %cst_21 = arith.constant 0.000000e+00 : f32
    %44 = vector.broadcast %cst_21 : f32 to vector<8x128xf32>
    %45 = arith.maximumf %43, %44 : vector<8x128xf32>
    %46 = arith.truncf %45 : vector<8x128xf32> to vector<8x128xbf16>
    %cst_22 = arith.constant dense<0.000000e+00> : vector<16x8xf32>
    %47 = tpu.matmul %11, %46, %cst_22 {dimension_numbers = #tpu.dot_dimension_numbers<[1], [1], [0], [0], [0, 0, 1, 0], [], []>} : vector<16x128xbf16>, vector<8x128xbf16>, vector<16x8xf32> -> vector<16x8xf32>
    %48 = vector.extract_strided_slice %47 {offsets = [0, 0], sizes = [1, 8], strides = [1, 1]} : vector<16x8xf32> to vector<1x8xf32>
    %49 = vector.broadcast %17 : vector<1x1xf32> to vector<1x8xf32>
    %50 = arith.addf %48, %49 : vector<1x8xf32>
    %c0_23 = arith.constant 0 : index
    %c0_24 = arith.constant 0 : index
    %51 = vector.load %arg5[%c0_23, %c0_24] : memref<1x8xf32, #tpu.memory_space<vmem>>, vector<1x8xf32>
    tpu.vector_store %arg5[%c0_23, %c0_24], %50 {strides = array<i32>} : memref<1x8xf32, #tpu.memory_space<vmem>>, vector<1x8xf32>,
    return
  }
  func.func @transform_0(%arg0: i32) -> (i32, i32) {
    %c0_i32 = arith.constant 0 : i32
    %c0_i32_0 = arith.constant 0 : i32
    return %arg0, %c0_i32 : i32, i32
  }
  func.func @transform_1(%arg0: i32) -> (i32, i32) {
    %c0_i32 = arith.constant 0 : i32
    %c0_i32_0 = arith.constant 0 : i32
    return %arg0, %c0_i32 : i32, i32
  }
  func.func @transform_2(%arg0: i32) -> (i32, i32) {
    %c0_i32 = arith.constant 0 : i32
    %c0_i32_0 = arith.constant 0 : i32
    return %arg0, %c0_i32 : i32, i32
  }
  func.func @transform_3(%arg0: i32) -> (i32, i32) {
    %c0_i32 = arith.constant 0 : i32
    %c0_i32_0 = arith.constant 0 : i32
    %c0_i32_1 = arith.constant 0 : i32
    return %c0_i32, %c0_i32_0 : i32, i32
  }
  func.func @transform_4(%arg0: i32) -> (i32, i32) {
    %c0_i32 = arith.constant 0 : i32
    %c0_i32_0 = arith.constant 0 : i32
    return %c0_i32, %arg0 : i32, i32
  }
}

</mosaic_0001>

<bundles_post_ra>
// kernel: tpu_custom_call.1
= control target key start
LH: loop header
LB: loop body
LE: loop exit
PB: predicated region body
PF: predicated region fallthrough
CT: control target
= control target key end

     0   :  { %9 = vsyncpa [#allocation3], 0  ;;  %s1048_s0 = inlined_call_operand.hbm [shape: f32[8,32], index: 0, kind: input, shape index: {}]   ;;  %s1049_s1 = inlined_call_operand.hbm [shape: f32[8,32], index: 1, kind: input, shape index: {}]   ;;  %s1050_s2 = inlined_call_operand.hbm [shape: f32[8,16], index: 2, kind: input, shape index: {}]   ;;  %s1051_s3 = inlined_call_operand.hbm [shape: bf16[464,128], index: 3, kind: input, shape index: {}]   ;;  %s1052_s4 = inlined_call_operand.hbm [shape: f32[1,8], index: 4, kind: output, shape index: {}]  }
   0x1   :  { %10 = vsyncpa [#allocation6], 0 }
   0x2   :  { %11 = vsyncpa [#allocation9], 0 }
   0x3   :  { %12 = vsyncpa [#allocation4], 0  ;;  %s943_s15 = smov [#allocation5]   ;;  %s944_s17 = smov [#allocation2]  }
   0x4   :  { %s29_s16 = sshll.u32 %s943_s15, 4  ;;  %s19_s18 = sshll.u32 %s944_s17, 4  ;;  %s30_s16 = int_to_ptr.vmem [resolvable:$true] %s29_s16  ;;  %s20_s18 = int_to_ptr.vmem [resolvable:$true] %s19_s18 }
   0x5   :  { %s843_s19 = scalar_lea.vmem %s30_s16, 128  ;;  %p848_p1 = scmp.lt.s32.totalorder %s30_s16, %s30_s16 }
   0x6   :  { %p844_p0 = scmp.ne.s32.totalorder %s30_s16, %s843_s19  ;;  %p849_p2 = scmp.lt.s32.totalorder %s843_s19, %s843_s19 }
   0x8   :  { %p850_p3 = por %p849_p2, %p848_p1 }
   0xa   :  { %p851_p4 = pnand %p850_p3, %p844_p0 }
   0xc   :  { %854 = shalt.err (!%p851_p4)
}
   0xd   :  { %32 = dma.hbm_to_vmem [thread:$0]  %s1049_s1, 128, %s30_s16, [#allocation6]  }
   0xe   :  { %s863_s22 = scalar_lea.vmem %s20_s18, 128  ;;  %p868_p6 = scmp.lt.s32.totalorder %s20_s18, %s20_s18 }
   0xf   :  { %p864_p5 = scmp.ne.s32.totalorder %s20_s18, %s863_s22  ;;  %p869_p7 = scmp.lt.s32.totalorder %s863_s22, %s863_s22 }
  0x11   :  { %p870_p8 = por %p869_p7, %p868_p6 }
  0x13   :  { %p871_p9 = pnand %p870_p8, %p864_p5 }
  0x15   :  { %874 = shalt.err (!%p871_p9)
}
  0x16   :  { %22 = dma.hbm_to_vmem [thread:$0]  %s1048_s0, 128, %s20_s18, [#allocation3]  }
  0x17   :  { %s945_s25 = smov [#allocation7]   ;;  %s946_s27 = smov [#allocation8]  }
  0x18   :  { %s39_s26 = sshll.u32 %s945_s25, 4  ;;  %s48_s28 = sshll.u32 %s946_s27, 4  ;;  %s40_s26 = int_to_ptr.vmem [resolvable:$true] %s39_s26  ;;  %s49_s28 = int_to_ptr.vmem [resolvable:$true] %s48_s28 }
  0x19   :  { %s883_s29 = scalar_lea.vmem %s40_s26, 128  ;;  %p888_p11 = scmp.lt.s32.totalorder %s40_s26, %s40_s26 }
  0x1a   :  { %p884_p10 = scmp.ne.s32.totalorder %s40_s26, %s883_s29  ;;  %p889_p12 = scmp.lt.s32.totalorder %s883_s29, %s883_s29 }
  0x1c   :  { %p890_p13 = por %p889_p12, %p888_p11 }
  0x1e   :  { %p891_p0 = pnand %p890_p13, %p884_p10 }
  0x20   :  { %894 = shalt.err (!%p891_p0)
}
  0x21   :  { %42 = dma.hbm_to_vmem [thread:$0]  %s1050_s2, 128, %s40_s26, [#allocation6]  }
  0x22   :  { %s903_s5 = scalar_lea.vmem %s49_s28, 3712  ;;  %p908_p2 = scmp.lt.s32.totalorder %s49_s28, %s49_s28 }
  0x23   :  { %p904_p1 = scmp.ne.s32.totalorder %s49_s28, %s903_s5  ;;  %p909_p3 = scmp.lt.s32.totalorder %s903_s5, %s903_s5 }
  0x25   :  { %p910_p4 = por %p909_p3, %p908_p2 }
  0x27   :  { %p911_p5 = pnand %p910_p4, %p904_p1 }
  0x29   :  { %914 = shalt.err (!%p911_p5)
}
  0x2a   :  { %s947_s0 = smov 64   ;;  %s948_s6 = smov 4  }
  0x2b   :  { %54 = dma.hbm_to_vmem [thread:$0]  %s1051_s3, 3712, %s49_s28, [#allocation9], %s947_s0, %s947_s0, %s948_s6  }
  0x2c   :  { %935 = dma.done.wait [#allocation3], 128  }
  0x2d   :  { %936 = vsyncadd [#allocation3], 4294967168 }
  0x2e   :  { %937 = dma.done.wait [#allocation6], 256  }
  0x2f   :  { %938 = vsyncadd [#allocation6], 4294967040 }
  0x30   :  { %939 = dma.done.wait [#allocation9], 3712  }
  0x31   :  { %940 = vsyncadd [#allocation9], 4294963584  ;;  %v949_v0 = vmov 0.0   ;;  %vm950_vm0 = vmmov 0   ;;  %v807_v1 = vld [vmem:[#allocation8 + $0x10] sm:$0xff]   ;;  %v72_v2 = vld [vmem:[#allocation7] sm:$0xff]  ;;  %v238_v26 = vlaneseq }
  0x32   :  { %708 = vmatprep.subr.bf16.mxu0 %v949_v0  ;;  %710 = vmatprep.mubr.msk.bf16.mxu0 %vm950_vm0, %v949_v0  ;;  %v73_v3 = vpack.c.bf16 %v72_v2, %v72_v2  ;;  %vm138_vm1 = vcmask 130048   ;;  %v808_v4 = vld [vmem:[#allocation8 + $0x8] sm:$0xff]   ;;  %v809_v5 = vld [vmem:[#allocation8] sm:$0xff]   ;;  %v812_v7 = vld [vmem:[#allocation8 + $0x90] sm:$0xff]   ;;  %vm194_vm2 = vcmask 261120   ;;  %s952_s2 = smov [#allocation10]  }
  0x33   :  { %730 = vmatprep.subr.bf16.mxu1 %v949_v0  ;;  %746 = vmatprep.mubr.msk.bf16.mxu1 %vm950_vm0, %v949_v0  ;;  %v68_v6 = vld [vmem:[#allocation2] sm:$0xff]  ;;  %v70_v10 = vld [vmem:[#allocation5] sm:$0xff]  ;;  %v813_v14 = vld [vmem:[#allocation8 + $0x40] sm:$0xff]   ;;  %v1023_v27 = vshrl.u32 %v238_v26, 7  ;;  %s629_s3 = sshll.u32 %s952_s2, 4  ;;  %vm621_vm3 = vcmask 57344   ;;  %s630_s3 = int_to_ptr.vmem [resolvable:$true] %s629_s3 }
  0x34   :  { %709 = vmatpush3.bf16.msra.mxu0 %v807_v1  ;;  %731 = vmatpush3.bf16.msra.mxu1 %v812_v7  ;;  %v814_v8 = vld [vmem:[#allocation8 + $0x88] sm:$0xff]   ;;  %v69_v9 = vpack.c.bf16 %v68_v6, %v68_v6  ;;  %v810_v11 = vld [vmem:[#allocation8 + $0x50] sm:$0xff]   ;;  %v71_v12 = vpack.c.bf16 %v70_v10, %v70_v10  ;;  %v815_v15 = vld [vmem:[#allocation8 + $0x38] sm:$0xff]   ;;  %s915_s9 = scalar_lea.vmem %s630_s3, 16  ;;  %s919_s10 = scalar_lea.vmem %s630_s3, 32 }
  0x35   :  { %714 = vmatprep.subr.bf16.mxu0 %v949_v0  ;;  %732 = vmatprep.subr.bf16.mxu1 %v949_v0  ;;  %v811_v13 = vld [vmem:[#allocation8 + $0x48] sm:$0xff]   ;;  %v816_v16 = vld [vmem:[#allocation8 + $0x80] sm:$0xff]   ;;  %v817_v17 = vld [vmem:[#allocation8 + $0x30] sm:$0xff]   ;;  %v240_v32 = vsub.s32 0, %v1023_v27  ;;  %v469_v62 = vsub.s32 1, %v1023_v27  ;;  %p916_p6 = scmp.ne.s32.totalorder %s630_s3, %s915_s9  ;;  %p920_p7 = scmp.lt.s32.totalorder %s630_s3, %s630_s3 }
  0x36   :  { %v818_v18 = vld [vmem:[#allocation8 + $0x78] sm:$0xff]   ;;  %v819_v19 = vld [vmem:[#allocation8 + $0x28] sm:$0xff]   ;;  %v820_v20 = vld [vmem:[#allocation8 + $0x70] sm:$0xff]   ;;  %p921_p8 = scmp.lt.s32.totalorder %s919_s10, %s915_s9 }
  0x37   :  { %711 = vmatmul.mubr.msk.bf16.vlgmr.msra.gmra.mxu0 %vm138_vm1, %v73_v3  ;;  %v821_v21 = vld [vmem:[#allocation8 + $0x20] sm:$0xff]   ;;  %v822_v22 = vld [vmem:[#allocation8 + $0x68] sm:$0xff]   ;;  %v823_v23 = vld [vmem:[#allocation8 + $0x18] sm:$0xff]  }
  0x38   :  { %715 = vmatpush3.bf16.msra.mxu0 %v808_v4  ;;  %718 = vmatprep.mubr.msk.bf16.mxu0 %vm950_vm0, %v949_v0  ;;  %v824_v24 = vld [vmem:[#allocation8 + $0x60] sm:$0xff]   ;;  %v825_v25 = vld [vmem:[#allocation8 + $0x58] sm:$0xff]   ;;  %v826_v51 = vld [vmem:[#allocation8 + $0xd0] sm:$0xff]   ;;  %p922_p9 = por %p921_p8, %p920_p7 }
  0x39   :  { %716 = vmatprep.subr.bf16.mxu0 %v949_v0  ;;  %733 = vmatpush3.bf16.msra.mxu1 %v814_v8  ;;  %v130_v29 = vld [vmem:[#allocation8 + $0xe0] sm:$0xf]  ;;  %v827_v53 = vld [vmem:[#allocation8 + $0xc8] sm:$0xff]   ;;  %v829_v55 = vld [vmem:[#allocation8 + $0xb8] sm:$0xff]  }
  0x3a   :  { %734 = vmatprep.subr.bf16.mxu1 %v949_v0  ;;  %v1025_v31 = vunpack.c.l.bf16 %v130_v29  ;;  %v828_v54 = vld [vmem:[#allocation8 + $0xc0] sm:$0xff]   ;;  %v830_v56 = vld [vmem:[#allocation8 + $0xb0] sm:$0xff]   ;;  %v831_v57 = vld [vmem:[#allocation8 + $0xa8] sm:$0xff]   ;;  %p923_p10 = pnand %p922_p9, %p916_p6 }
  0x3b   :  { %v832_v58 = vld [vmem:[#allocation8 + $0xa0] sm:$0xff]   ;;  %v833_v59 = vld [vmem:[#allocation8 + $0x98] sm:$0xff]  }
  0x3c   :  { %717 = vmatpush3.bf16.msra.mxu0 %v809_v5  ;;  %v241_v35 = vrot.slane %v1025_v31, %v240_v32  ;;  %v470_v2 = vrot.slane %v1025_v31, %v469_v62 }
  0x3d   :  { %722 = vmatprep.subr.bf16.mxu0 %v949_v0  ;;  %735 = vmatpush3.bf16.msra.mxu1 %v816_v16 }
  0x3e   :  { %736 = vmatprep.subr.bf16.mxu1 %v949_v0 }
  0x3f   :  { %719 = vmatmul.mubr.msk.bf16.vlgmr.msra.gmra.mxu0 %vm194_vm2, %v69_v9 }
  0x40   :  { %723 = vmatpush3.bf16.msra.mxu0 %v808_v4  ;;  %726 = vmatprep.mubr.msk.bf16.mxu0 %vm950_vm0, %v949_v0 }
  0x41   :  { %724 = vmatprep.subr.bf16.mxu0 %v949_v0  ;;  %737 = vmatpush3.bf16.msra.mxu1 %v818_v18 }
  0x42   :  { %738 = vmatprep.subr.bf16.mxu1 %v949_v0 }
  0x44   :  { %725 = vmatpush3.bf16.msra.mxu0 %v809_v5 }
  0x45   :  { %750 = vmatprep.subr.bf16.mxu0 %v949_v0  ;;  %739 = vmatpush3.bf16.msra.mxu1 %v820_v20  ;;  %v834_v20 = vld [vmem:[#allocation8 + $0xd8] sm:$0xff]  }
  0x46   :  { %740 = vmatprep.subr.bf16.mxu1 %v949_v0 }
  0x47   :  { %727 = vmatmul.mubr.msk.bf16.vlgmr.msra.gmra.mxu0 %vm194_vm2, %v71_v12 }
  0x48   :  { %751 = vmatpush3.bf16.msra.mxu0 %v810_v11  ;;  %766 = vmatprep.mubr.msk.bf16.mxu0 %vm950_vm0, %v949_v0  ;;  %v476_v11 = vsub.s32 2, %v1023_v27 }
  0x49   :  { %752 = vmatprep.subr.bf16.mxu0 %v949_v0  ;;  %741 = vmatpush3.bf16.msra.mxu1 %v822_v22 }
  0x4a   :  { %742 = vmatprep.subr.bf16.mxu1 %v949_v0  ;;  %v477_v12 = vrot.slane %v1025_v31, %v476_v11 }
  0x4c   :  { %753 = vmatpush3.bf16.msra.mxu0 %v811_v13 }
  0x4d   :  { %754 = vmatprep.subr.bf16.mxu0 %v949_v0  ;;  %743 = vmatpush3.bf16.msra.mxu1 %v824_v24 }
  0x4e   :  { %744 = vmatprep.subr.bf16.mxu1 %v949_v0 }
  0x50   :  { %755 = vmatpush3.bf16.msra.mxu0 %v813_v14 }
  0x51   :  { %756 = vmatprep.subr.bf16.mxu0 %v949_v0  ;;  %745 = vmatpush3.bf16.msra.mxu1 %v825_v25 }
  0x52   :  { %770 = vmatprep.subr.bf16.mxu1 %v949_v0 }
  0x54   :  { %757 = vmatpush3.bf16.msra.mxu0 %v815_v15 }
  0x55   :  { %758 = vmatprep.subr.bf16.mxu0 %v949_v0 }
  0x58   :  { %759 = vmatpush3.bf16.msra.mxu0 %v817_v17 }
  0x59   :  { %760 = vmatprep.subr.bf16.mxu0 %v949_v0 }
  0x5c   :  { %761 = vmatpush3.bf16.msra.mxu0 %v819_v19 }
  0x5d   :  { %762 = vmatprep.subr.bf16.mxu0 %v949_v0 }
  0x60   :  { %763 = vmatpush3.bf16.msra.mxu0 %v821_v21 }
  0x61   :  { %764 = vmatprep.subr.bf16.mxu0 %v949_v0 }
  0x64   :  { %765 = vmatpush3.bf16.msra.mxu0 %v823_v23 }
  0x65   :  { %790 = vmatprep.subr.bf16.mxu0 %v949_v0 }
  0xf7   :  { %v176_v28 = vpop.f32.mrf.mxu0 }
  0xf9   :  { %v712_v30 = vpop.f32.mrf.mxu0 }
  0xfb   :  { %v179_v33 = vpop.f32.mrf.mxu0 }
  0xfd   :  { %v713_v34 = vpop.f32.mrf.mxu0 }
  0xff   :  { %v232_v36 = vpop.f32.mrf.mxu0 }
 0x100   :  { %v233_v37 = vadd.f32 %v232_v36, %v176_v28 }
 0x101   :  { %v720_v38 = vpop.f32.mrf.mxu0 }
 0x102   :  { %v242_v39 = vadd.f32 %v241_v35, %v233_v37 }
 0x103   :  { %v235_v40 = vpop.f32.mrf.mxu0 }
 0x104   :  { %v243_v41 = vmax.f32 %v242_v39, 0.0 }
 0x105   :  { %v721_v42 = vpop.f32.mrf.mxu0 }
 0x106   :  { %v244_v43 = vpack.c.bf16 %v243_v41, %v243_v41 }
 0x107   :  { %v282_v44 = vpop.f32.mrf.mxu0 }
 0x108   :  { %v283_v45 = vadd.f32 %v282_v44, %v176_v28  ;;  %767 = vmatmul.mubr.bf16.vlgmr.msra.gmra.mxu0 %v244_v43 }
 0x109   :  { %v728_v46 = vpop.f32.mrf.mxu0  ;;  %792 = vmatprep.mubr.msk.bf16.mxu0 %vm950_vm0, %v949_v0 }
 0x10a   :  { %v288_v47 = vadd.f32 %v283_v45, %v241_v35 }
 0x10b   :  { %v285_v48 = vpop.f32.mrf.mxu0 }
 0x10c   :  { %v289_v49 = vmax.f32 %v288_v47, 0.0 }
 0x10d   :  { %v729_v50 = vpop.f32.mrf.mxu0 }
 0x10e   :  { %v290_v52 = vpack.c.bf16 %v289_v49, %v289_v49 }
 0x110   :  { %747 = vmatmul.mubr.bf16.vlgmr.msra.gmra.mxu1 %v290_v52 }
 0x111   :  { %771 = vmatpush3.bf16.msra.mxu1 %v826_v51  ;;  %786 = vmatprep.mubr.msk.bf16.mxu1 %vm950_vm0, %v949_v0 }
 0x112   :  { %772 = vmatprep.subr.bf16.mxu1 %v949_v0 }
 0x115   :  { %773 = vmatpush3.bf16.msra.mxu1 %v827_v53 }
 0x116   :  { %774 = vmatprep.subr.bf16.mxu1 %v949_v0 }
 0x119   :  { %775 = vmatpush3.bf16.msra.mxu1 %v828_v54 }
 0x11a   :  { %776 = vmatprep.subr.bf16.mxu1 %v949_v0 }
 0x11d   :  { %777 = vmatpush3.bf16.msra.mxu1 %v829_v55 }
 0x11e   :  { %778 = vmatprep.subr.bf16.mxu1 %v949_v0 }
 0x121   :  { %779 = vmatpush3.bf16.msra.mxu1 %v830_v56 }
 0x122   :  { %780 = vmatprep.subr.bf16.mxu1 %v949_v0 }
 0x125   :  { %781 = vmatpush3.bf16.msra.mxu1 %v831_v57 }
 0x126   :  { %782 = vmatprep.subr.bf16.mxu1 %v949_v0 }
 0x129   :  { %783 = vmatpush3.bf16.msra.mxu1 %v832_v58 }
 0x12a   :  { %784 = vmatprep.subr.bf16.mxu1 %v949_v0  ;;  %v951_v0 = vmov 0  }
 0x12b   :  { %806 = vset.pattern.permute.xlu0 %v951_v0 }
 0x12c   :  { %616 = vperm.xlu0 %806, %v1025_v31  }
 0x12d   :  { %785 = vmatpush3.bf16.msra.mxu1 %v833_v59 }
 0x1a7   :  { %v617_v21 = vpop.permute.xlu0 %616 }
 0x1a8   :  { %v618_v22 = vrot.slane %v617_v21, 3 }
 0x1c8   :  { %v461_v60 = vpop.f32.mrf.mxu0 }
 0x1ca   :  { %v768_v61 = vpop.f32.mrf.mxu0 }
 0x1cc   :  { %v464_v63 = vpop.f32.mrf.mxu0 }
 0x1ce   :  { %v769_v1 = vpop.f32.mrf.mxu0 }
 0x1d0   :  { %v373_v3 = vpop.f32.mrf.mxu1 }
 0x1d1   :  { %v462_v4 = vadd.f32 %v461_v60, %v373_v3 }
 0x1d2   :  { %v748_v5 = vpop.f32.mrf.mxu1 }
 0x1d3   :  { %v471_v6 = vadd.f32 %v470_v2, %v462_v4 }
 0x1d4   :  { %v376_v7 = vpop.f32.mrf.mxu1 }
 0x1d5   :  { %v472_v8 = vmax.f32 %v471_v6, 0.0 }
 0x1d6   :  { %v749_v9 = vpop.f32.mrf.mxu1 }
 0x1d7   :  { %v473_v10 = vpack.c.bf16 %v472_v8, %v472_v8 }
 0x1d9   :  { %787 = vmatmul.mubr.bf16.vlgmr.msra.gmra.mxu1 %v473_v10 }
 0x299   :  { %v560_v13 = vpop.f32.mrf.mxu1 }
 0x29a   :  { %v561_v14 = vadd.f32 %v560_v13, %v477_v12 }
 0x29b   :  { %v788_v15 = vpop.f32.mrf.mxu1 }
 0x29c   :  { %v566_v16 = vmax.f32 %v561_v14, 0.0 }
 0x29d   :  { %v563_v17 = vpop.f32.mrf.mxu1 }
 0x29e   :  { %v567_v18 = vpack.c.bf16 %v566_v16, %v566_v16 }
 0x29f   :  { %v789_v19 = vpop.f32.mrf.mxu1 }
 0x2a0   :  { %791 = vmatpush3.bf16.xpose.msra.mxu0 %v567_v18 }
 0x2a7   :  { %793 = vmatmul.mubr.bf16.vlgmr.msra.gmra.mxu0 %v834_v20 }
 0x367   :  { %v608_v23 = vpop.f32.mrf.mxu0 }
 0x368   :  { %v620_v24 = vadd.f32 %v618_v22, %v608_v23 }
 0x369   :  { %v794_v25 = vpop.f32.mrf.mxu0 }
 0x36a   :  { %622 = vst.msk [vmem:[#allocation10] sm:$0x1] %vm621_vm3, %v620_v24 }
 0x36b   :  { %v611_v26 = vpop.f32.mrf.mxu0 }
 0x36c   :  { %926 = shalt.err (!%p923_p10)
}
 0x36d   :  { %632 = dma.vmem_to_hbm [thread:$0]  %s630_s3, 16, %s1052_s4, [#allocation4]   ;;  %v795_v27 = vpop.f32.mrf.mxu0 }
 0x36e   :  { %941 = dma.done.wait [#allocation4], 16  }
 0x36f   :  { %942 = vsyncadd [#allocation4], 4294967280 }
 0x370   :  { %636 = vsyncpa [#allocation3], 1 }
 0x371   :  { %637 = vsyncpa [#allocation6], 1 }
 0x372   :  { %638 = vsyncpa [#allocation9], 1 }
 0x373   :  { %639 = vsyncpa [#allocation4], 1 }

</bundles_post_ra>
